<compile_context>
chip_gen: v5e
topology: v5e:2x2
jax: 0.10.0
libtpu: 0.0.40
codegen_flags: <defaults>
</compile_context>

<pallas_src>
import functools

import jax
import jax.numpy as jnp
from jax.experimental import pallas as pl
from jax.experimental.pallas import tpu as pltpu

KEY2CATDIM = {"vector": 1, "crossattn": 2, "concat": 1, "ref_image": 0}


def _round_up(x, m):
    return (x + m - 1) // m * m


def _round_down(x, m):
    return max(m, x // m * m)


@functools.lru_cache()
def _vmem_budget_and_limit():
    """Per-generation scoped-VMEM limit and tile-selection budget."""
    phys = 64 * 1024 * 1024  # conservative fallback (v7x per-TC VMEM)
    try:
        info = pltpu.get_tpu_info()
        for name in ("vmem_capacity_bytes", "vmem_size_bytes", "vmem_bytes"):
            v = getattr(info, name, None)
            if v:
                phys = int(v)
                break
    except Exception:
        pass
    limit = min(phys * 3 // 4, 96 * 1024 * 1024)   # v5e/v6e -> 96 MiB, v7x -> 48 MiB
    budget = limit * 2 // 3
    return budget, limit


# ---------------------------------------------------------------------------
# Kernel 1: fused txt projection (all 'txt' embedders in one call)
#   y[b, s, :] = ((x[b, s, :] @ W_cat) + b_cat) * scale[b, :]
#   x_ref : VMEM (1, ts, Din)   bf16 row tile of one batch element
#   w_ref : VMEM (Din, Ntot)    bf16, resident (constant-index BlockSpec)
#   b_ref : VMEM (1, Ntot)      f32, resident
#   s_ref : VMEM (1, 1, Ntot)   f32 per-batch scale row (ucg keep / force-zero)
#   o_ref : VMEM (1, ts, Ntot)  lane-dense output tile (bf16 by default)
# ---------------------------------------------------------------------------
def _fused_txt_kernel(x_ref, w_ref, b_ref, s_ref, o_ref):
    acc = jnp.dot(x_ref[0], w_ref[...], preferred_element_type=jnp.float32)
    o_ref[0] = ((acc + b_ref[...]) * s_ref[0]).astype(o_ref.dtype)


def pallas_fused_txt_proj(x, W_cat, b_cat, scale, *, out_dtype=jnp.bfloat16):
    """x:(B,S,Din), W_cat:(Din,Ntot) bf16, b_cat:(Ntot,) f32, scale:(B,Ntot) f32
    -> (B,S,Ntot) out_dtype."""
    B, S, Din = x.shape
    Ntot = W_cat.shape[1]
    x = x.astype(W_cat.dtype)                      # bf16 activations: halve input DMA
    budget, limit = _vmem_budget_and_limit()
    out_bytes = jnp.dtype(out_dtype).itemsize

    def est(t):
        xin = 2 * t * Din * x.dtype.itemsize       # double-buffered input tile
        out = 2 * t * Ntot * out_bytes             # double-buffered output tile
        acc = t * Ntot * 4                         # f32 accumulator (live temp)
        resident = Din * Ntot * W_cat.dtype.itemsize + 2 * Ntot * 4
        return xin + out + acc + resident + (512 << 10)   # + Mosaic scratch slack

    ts = min(_round_up(S, 8), 1024)
    while ts > 8 and est(ts) > budget:
        ts = _round_down(ts // 2, 8)

    n_row_tiles = pl.cdiv(S, ts)
    if B * n_row_tiles < 2 and S > 8:              # expose >=2 parallel steps (v7x: 2 TCs)
        ts = max(8, _round_up(pl.cdiv(S, 2), 8))
        n_row_tiles = pl.cdiv(S, ts)

    return pl.pallas_call(
        _fused_txt_kernel,
        out_shape=jax.ShapeDtypeStruct((B, S, Ntot), out_dtype),
        grid=(B, n_row_tiles),
        in_specs=[
            pl.BlockSpec((1, ts, Din), lambda bi, si: (bi, si, 0)),     # x rows
            pl.BlockSpec((Din, Ntot), lambda bi, si: (0, 0)),           # W resident
            pl.BlockSpec((1, Ntot), lambda bi, si: (0, 0)),             # bias resident
            pl.BlockSpec((1, 1, Ntot), lambda bi, si: (bi, 0, 0)),      # per-batch scale
        ],
        out_specs=pl.BlockSpec((1, ts, Ntot), lambda bi, si: (bi, si, 0)),
        compiler_params=pltpu.CompilerParams(
            dimension_semantics=("parallel", "parallel"),
            vmem_limit_bytes=limit),
    )(x, W_cat, b_cat.reshape(1, Ntot), scale.reshape(B, 1, Ntot))


# ---------------------------------------------------------------------------
# Kernel 2: 1x1 conv ('ref_image'), computed directly in NCHW:
#   y[b] (Cout, HW) = W^T (Cout, Cin) @ x[b] (Cin, HW) + bias, scaled by keep[b]
#   Lane dim is HW -> lane-dense stores; no NHWC round trip.
# ---------------------------------------------------------------------------
def _pointwise_conv_kernel(keep_ref, x_ref, wt_ref, b_ref, o_ref):
    bidx = pl.program_id(0)
    acc = jnp.dot(wt_ref[...], x_ref[0], preferred_element_type=jnp.float32)
    o_ref[0] = ((acc + b_ref[...]) * keep_ref[bidx]).astype(o_ref.dtype)


def pallas_pointwise_conv(x_nchw, W, b, keep, *, out_dtype=jnp.bfloat16):
    """x:(B,C,H,W), W:(Cin,Cout) bf16, b:(Cout,) f32, keep:(B,) f32
    -> (B,Cout,H,W) out_dtype (NCHW)."""
    B, C, H, Wd = x_nchw.shape
    Cout = W.shape[1]
    HW = H * Wd
    x = x_nchw.reshape(B, C, HW).astype(W.dtype)   # bf16 activations
    budget, limit = _vmem_budget_and_limit()
    out_bytes = jnp.dtype(out_dtype).itemsize

    def est(t):
        xin = 2 * C * t * x.dtype.itemsize
        out = 2 * Cout * t * out_bytes
        acc = Cout * t * 4
        resident = C * Cout * W.dtype.itemsize + Cout * 4
        return xin + out + acc + resident + (512 << 10)

    if HW <= 128:
        t_hw = HW                                   # full-extent last dim
    else:
        t_hw = _round_down(HW, 128)                 # whole image per step if it fits
        while t_hw > 128 and est(t_hw) > budget:
            t_hw = _round_down(t_hw // 2, 128)

    n_col_tiles = pl.cdiv(HW, t_hw)
    if B * n_col_tiles < 2 and HW >= 256:           # keep both v7x TCs busy at B==1
        t_hw = _round_down(_round_up(HW // 2, 128), 128)
        n_col_tiles = pl.cdiv(HW, t_hw)

    Wt = jnp.transpose(W)                           # (Cout, Cin), tiny
    y = pl.pallas_call(
        _pointwise_conv_kernel,
        out_shape=jax.ShapeDtypeStruct((B, Cout, HW), out_dtype),
        grid=(B, n_col_tiles),
        in_specs=[
            pl.BlockSpec(memory_space=pltpu.MemorySpace.SMEM),          # keep (B,) 1-D
            pl.BlockSpec((1, C, t_hw), lambda bi, ji: (bi, 0, ji)),     # x cols
            pl.BlockSpec((Cout, C), lambda bi, ji: (0, 0)),             # W^T resident
            pl.BlockSpec((Cout, 1), lambda bi, ji: (0, 0)),             # bias resident
        ],
        out_specs=pl.BlockSpec((1, Cout, t_hw), lambda bi, ji: (bi, 0, ji)),
        compiler_params=pltpu.CompilerParams(
            dimension_semantics=("parallel", "parallel"),
            vmem_limit_bytes=limit),
    )(keep.astype(jnp.float32), x, Wt, b.reshape(Cout, 1).astype(jnp.float32))
    return y.reshape(B, Cout, H, Wd)


# ---------------------------------------------------------------------------
# Synthetic embedders (deterministic init) + GeneralConditioner forward
# ---------------------------------------------------------------------------
def make_embedder(key, input_key, in_dim, out_dim, ucg_rate=0.0):
    kw, kb = jax.random.split(key)
    W = (jax.random.normal(kw, (in_dim, out_dim), jnp.float32)
         / jnp.sqrt(jnp.float32(in_dim))).astype(jnp.bfloat16)  # bf16 MXU operands
    b = 0.01 * jax.random.normal(kb, (out_dim,), jnp.float32)
    return {"input_key": input_key, "ucg_rate": float(ucg_rate), "W": W, "b": b}


def conditioner_forward(embedders, batch, force_zero_embeddings=None, ucg_key=None,
                        out_dtype=jnp.bfloat16):
    """Mirrors GeneralConditioner.forward (cor_embs=[]); outputs in out_dtype."""
    output = {}
    fz = force_zero_embeddings or []
    if ucg_key is None:
        ucg_key = jax.random.PRNGKey(1)

    # Per-embedder keep masks (bernoulli ucg dropout; force_zero == keep 0).
    keeps = []
    for e in embedders:
        B = batch[e["input_key"]].shape[0]
        if e["ucg_rate"] > 0.0:
            ucg_key, sub = jax.random.split(ucg_key)
            keep = jax.random.bernoulli(
                sub, 1.0 - e["ucg_rate"], (B,)).astype(jnp.float32)
        else:
            keep = jnp.ones((B,), jnp.float32)
        if e["input_key"] in fz:
            keep = jnp.zeros((B,), jnp.float32)
        keeps.append(keep)

    # --- fused txt path -> 'crossattn' (concat along dim 2 is the fusion) ---
    txt_idx = [i for i, e in enumerate(embedders) if e["input_key"] == "txt"]
    if txt_idx:
        x = batch["txt"]                                        # (B, S, Din)
        B = x.shape[0]
        W_cat = jnp.concatenate([embedders[i]["W"] for i in txt_idx], axis=1)
        b_cat = jnp.concatenate([embedders[i]["b"] for i in txt_idx], axis=0)
        # Tiny (B, Ntot) scale table: keep[i,b] expanded over embedder i's columns.
        scale = jnp.concatenate(
            [jnp.broadcast_to(keeps[i][:, None],
                              (B, int(embedders[i]["W"].shape[1])))
             for i in txt_idx], axis=1)
        output["crossattn"] = pallas_fused_txt_proj(
            x, W_cat, b_cat, scale, out_dtype=out_dtype)

    # --- ref_image path -> 'ref_image' (concat along dim 0) ---
    for i, e in enumerate(embedders):
        if e["input_key"] != "ref_image":
            continue
        y = pallas_pointwise_conv(batch["ref_image"], e["W"], e["b"], keeps[i],
                                  out_dtype=out_dtype)
        if "ref_image" in output:
            output["ref_image"] = jnp.concatenate(
                [output["ref_image"], y], axis=KEY2CATDIM["ref_image"])
        else:
            output["ref_image"] = y

    return output


# TODO(synk): legacy_ucg_val / cor_embs paths mutate the raw batch with a host-side
# numpy RNG; not representable as device compute, so only the standard ucg path
# (bernoulli keep-mask multiply) is implemented.


if __name__ == "__main__":
    root = jax.random.PRNGKey(0)
    k_txt, k_img, k_e1, k_e2, k_e3 = jax.random.split(root, 5)

    # batch: txt tokens (B, S, Din) and ref image NCHW (B, C, H, W)
    B, S, DIN, H1, H2 = 2, 8, 32, 64, 64
    C, HS, WS, COUT = 4, 16, 16, 8
    batch = {
        "txt": jax.random.normal(k_txt, (B, S, DIN), jnp.float32),
        "ref_image": jax.random.normal(k_img, (B, C, HS, WS), jnp.float32),
    }

    embedders = [
        make_embedder(k_e1, "txt", DIN, H1, ucg_rate=0.0),
        make_embedder(k_e2, "txt", DIN, H2, ucg_rate=0.5),   # exercises ucg mask
        make_embedder(k_e3, "ref_image", C, COUT, ucg_rate=0.0),
    ]

    out = conditioner_forward(embedders, batch, force_zero_embeddings=None,
                              ucg_key=jax.random.PRNGKey(1))
    jax.block_until_ready(out)

    # shape / semantics checks
    assert out["crossattn"].shape == (B, S, H1 + H2)          # concat along dim 2
    assert out["ref_image"].shape == (B, COUT, HS, WS)        # NCHW out, concat dim 0

    # Pure-JAX references computed entirely in f32 (bf16-rounded operands
    # upcast first) -- avoids bf16 x bf16 dots that the host backend rejects,
    # while still mirroring the kernel's bf16-operand / f32-accumulate math.
    x32 = batch["txt"].astype(jnp.bfloat16).astype(jnp.float32)
    w0 = embedders[0]["W"].astype(jnp.float32)
    ref0 = jnp.einsum("bsd,dh->bsh", x32, w0) + embedders[0]["b"]
    got0 = out["crossattn"][..., :H1].astype(jnp.float32)
    assert jnp.allclose(got0, ref0, atol=3e-2, rtol=3e-2)

    xi32 = batch["ref_image"].astype(jnp.bfloat16).astype(jnp.float32)
    wi = embedders[2]["W"].astype(jnp.float32)
    ref_img = (jnp.einsum("bchw,cd->bdhw", xi32, wi)
               + embedders[2]["b"].reshape(1, COUT, 1, 1))
    got_img = out["ref_image"].astype(jnp.float32)
    assert jnp.allclose(got_img, ref_img, atol=3e-2, rtol=3e-2)

    # force_zero_embeddings path (as used by get_unconditional_conditioning)
    out_uc = conditioner_forward(embedders, batch,
                                 force_zero_embeddings=["txt"],
                                 ucg_key=jax.random.PRNGKey(1))
    jax.block_until_ready(out_uc)
    assert jnp.allclose(out_uc["crossattn"].astype(jnp.float32), 0.0)

    print("KERNEL_OK")
</pallas_src>

<mosaic_0001>
module attributes {stable_mosaic.version = 11 : i64} {
  func.func @_fused_txt_kernel(%arg0: i32, %arg1: i32, %arg2: memref<1x8x32xbf16, #tpu.memory_space<vmem>>, %arg3: memref<32x128xbf16, #tpu.memory_space<vmem>>, %arg4: memref<1x128xf32, #tpu.memory_space<vmem>>, %arg5: memref<1x1x128xf32, #tpu.memory_space<vmem>>, %arg6: memref<1x8x128xbf16, #tpu.memory_space<vmem>>) attributes {dimension_semantics = [#tpu.dimension_semantics<parallel>, #tpu.dimension_semantics<parallel>], iteration_bounds = array<i64: 2, 1>, scalar_prefetch = 0 : i64, scratch_operands = 0 : i64, tpu.core_type = #tpu.core_type<tc>, window_params = [{transform_indices = @transform_0, window_bounds = array<i64: 1, 8, 32>}, {pipeline_mode = #tpu.pipeline_mode<synchronous>, transform_indices = @transform_1, window_bounds = array<i64: 32, 128>}, {pipeline_mode = #tpu.pipeline_mode<synchronous>, transform_indices = @transform_2, window_bounds = array<i64: 1, 128>}, {transform_indices = @transform_3, window_bounds = array<i64: 1, 1, 128>}, {transform_indices = @transform_4, window_bounds = array<i64: 1, 8, 128>}]} {
    %c0 = arith.constant 0 : index
    %c0_0 = arith.constant 0 : index
    %c0_1 = arith.constant 0 : index
    %0 = vector.load %arg2[%c0, %c0_0, %c0_1] : memref<1x8x32xbf16, #tpu.memory_space<vmem>>, vector<1x8x32xbf16>
    %1 = vector.shape_cast %0 : vector<1x8x32xbf16> to vector<8x32xbf16>
    %c0_2 = arith.constant 0 : index
    %c0_3 = arith.constant 0 : index
    %2 = vector.load %arg3[%c0_2, %c0_3] : memref<32x128xbf16, #tpu.memory_space<vmem>>, vector<32x128xbf16>
    %cst = arith.constant dense<0.000000e+00> : vector<8x128xf32>
    %3 = tpu.matmul %1, %2, %cst {dimension_numbers = #tpu.dot_dimension_numbers<[1], [0], [0], [1], [0, 0, 1, 1], [], []>} : vector<8x32xbf16>, vector<32x128xbf16>, vector<8x128xf32> -> vector<8x128xf32>
    %c0_4 = arith.constant 0 : index
    %c0_5 = arith.constant 0 : index
    %4 = vector.load %arg4[%c0_4, %c0_5] : memref<1x128xf32, #tpu.memory_space<vmem>>, vector<1x128xf32>
    %5 = vector.broadcast %4 : vector<1x128xf32> to vector<8x128xf32>
    %6 = arith.addf %3, %5 : vector<8x128xf32>
    %c0_6 = arith.constant 0 : index
    %c0_7 = arith.constant 0 : index
    %c0_8 = arith.constant 0 : index
    %7 = vector.load %arg5[%c0_6, %c0_7, %c0_8] : memref<1x1x128xf32, #tpu.memory_space<vmem>>, vector<1x1x128xf32>
    %8 = vector.shape_cast %7 : vector<1x1x128xf32> to vector<1x128xf32>
    %9 = vector.broadcast %8 : vector<1x128xf32> to vector<8x128xf32>
    %10 = arith.mulf %6, %9 : vector<8x128xf32>
    %11 = arith.truncf %10 : vector<8x128xf32> to vector<8x128xbf16>
    %c0_9 = arith.constant 0 : index
    %c0_10 = arith.constant 0 : index
    %c0_11 = arith.constant 0 : index
    %12 = vector.load %arg6[%c0_9, %c0_10, %c0_11] : memref<1x8x128xbf16, #tpu.memory_space<vmem>>, vector<1x8x128xbf16>
    %13 = vector.shape_cast %12 : vector<1x8x128xbf16> to vector<8x128xbf16>
    %14 = vector.shape_cast %11 : vector<8x128xbf16> to vector<1x8x128xbf16>
    tpu.vector_store %arg6[%c0_9, %c0_10, %c0_11], %14 {strides = array<i32>} : memref<1x8x128xbf16, #tpu.memory_space<vmem>>, vector<1x8x128xbf16>,
    return
  }
  func.func @transform_0(%arg0: i32, %arg1: i32) -> (i32, i32, i32) {
    %c0_i32 = arith.constant 0 : i32
    %c0_i32_0 = arith.constant 0 : i32
    return %arg0, %arg1, %c0_i32 : i32, i32, i32
  }
  func.func @transform_1(%arg0: i32, %arg1: i32) -> (i32, i32) {
    %c0_i32 = arith.constant 0 : i32
    %c0_i32_0 = arith.constant 0 : i32
    %c0_i32_1 = arith.constant 0 : i32
    return %c0_i32, %c0_i32_0 : i32, i32
  }
  func.func @transform_2(%arg0: i32, %arg1: i32) -> (i32, i32) {
    %c0_i32 = arith.constant 0 : i32
    %c0_i32_0 = arith.constant 0 : i32
    %c0_i32_1 = arith.constant 0 : i32
    return %c0_i32, %c0_i32_0 : i32, i32
  }
  func.func @transform_3(%arg0: i32, %arg1: i32) -> (i32, i32, i32) {
    %c0_i32 = arith.constant 0 : i32
    %c0_i32_0 = arith.constant 0 : i32
    %c0_i32_1 = arith.constant 0 : i32
    return %arg0, %c0_i32, %c0_i32_0 : i32, i32, i32
  }
  func.func @transform_4(%arg0: i32, %arg1: i32) -> (i32, i32, i32) {
    %c0_i32 = arith.constant 0 : i32
    %c0_i32_0 = arith.constant 0 : i32
    return %arg0, %arg1, %c0_i32 : i32, i32, i32
  }
}

</mosaic_0001>

<bundles_post_ra>
// kernel: tpu_custom_call.1
= control target key start
LH: loop header
LB: loop body
LE: loop exit
PB: predicated region body
PF: predicated region fallthrough
CT: control target
= control target key end

     0   :  { %9 = vsyncpa [#allocation3], 0  ;;  %s919_s0 = inlined_call_operand.hbm [shape: bf16[2,8,32], index: 0, kind: input, shape index: {}]   ;;  %s920_s1 = inlined_call_operand.hbm [shape: bf16[32,128], index: 1, kind: input, shape index: {}]   ;;  %s921_s2 = inlined_call_operand.hbm [shape: f32[1,128], index: 2, kind: input, shape index: {}]   ;;  %s922_s3 = inlined_call_operand.vmem [shape: f32[2,1,128], index: 3, kind: input, shape index: {}]   ;;  %s923_s4 = inlined_call_operand.hbm [shape: bf16[2,8,128], index: 4, kind: output, shape index: {}]  }
   0x1   :  { %11 = vsyncpa [#allocation3 + $0x1], 0 }
   0x2   :  { %12 = vsyncpa [#allocation6], 0 }
   0x3   :  { %13 = vsyncpa [#allocation4], 0 }
   0x4   :  { %15 = vsyncpa [#allocation4 + $0x1], 0  ;;  %s770_s15 = smov 0   ;;  %s772_s16 = smov 0  }
   0x5   :  { %s774_s17 = smov 0   ;;  %s776_s18 = smov 0  }
   0x6   :  { %s778_s19 = smov 0   ;;  %s780_s20 = smov 0  }
   0x7 LB: > { %s448_s21 = sadd.s32 4294967295, %s739_s20   ;;  %p450_p0 = scmp.ge.s32.totalorder %s739_s20, 1  ;;  %s739_s20 = sphi %s780_s20, %s21_s20   ;;  %s735_s19 = sphi %s778_s19, %s933_s19   ;;  %s731_s18 = sphi %s776_s18, %s932_s18   ;;  %s727_s17 = sphi %s774_s17, %s931_s17   ;;  %s723_s16 = sphi %s772_s16, %s930_s16   ;;  %s719_s15 = sphi %s770_s15, %s929_s15  }
   0x8   : > { %p804_p1 = scmp.eq.s32.totalorder %s448_s21, 0  ;;  %p162_p2 = scmp.lt.s32.totalorder %s739_s20, 3 }
   0x9   : > { %s173_s25 = sshll.u32 %s920_s1, 4  ;;  %s741_s27 = smov [#allocation5]   ;;  %s174_s25 = int_to_ptr.hbm [resolvable:$true] %s173_s25 }
   0xa   : > { %p812_p3 = pnand %p450_p0, %p162_p2  ;;  %s175_s28 = sshll.u32 %s741_s27, 4  ;;  %s176_s28 = int_to_ptr.vmem [resolvable:$true] %s175_s28 }
   0xb   : > { %p453_p6 = scmp.ge.s32.totalorder %s739_s20, 2  ;;  %s188_s5 = sshll.u32 %s921_s2, 4  ;;  %s189_s5 = int_to_ptr.hbm [resolvable:$true] %s188_s5 }
   0xc   : > { %p488_p4 = pneg %p812_p3  ;;  %s742_s6 = smov 64  }
   0xd   : > { %s743_s7 = smov 4   ;;  %s744_s8 = smov [#allocation7]  }
   0xe   : > { %p489_p5 = pnand %p488_p4, %p804_p1  ;;  %s190_s9 = sshll.u32 %s744_s8, 4  ;;  %s191_s9 = int_to_ptr.vmem [resolvable:$true] %s190_s9 }
   0xf   : > { %s33_s10 = sadd.s32 1, %s735_s19  ;;  %s449_s11 = sadd.s32 4294967294, %s739_s20  }
  0x10   : > { %491 = dma.hbm_to_vmem [thread:$0]  (!%p489_p5), %s174_s25, 256, %s176_s28, [#allocation6], %s742_s6, %s742_s6, %s743_s7  }
  0x11   : > { %494 = dma.hbm_to_vmem [thread:$0]  (!%p489_p5), %s189_s5, 16, %s191_s9, [#allocation6]  }
  0x12   : > { %p35_p7 = scmp.ge.s32.totalorder %s33_s10, 2  ;;  %s42_s12 = sadd.s32 1, %s727_s17 }
  0x13   : > { %p49_p8 = scmp.ne.s32.totalorder %s727_s17, %s723_s16  ;;  %p50_p9 = scmp.eq.s32.totalorder %s739_s20, 0 }
  0x14   : > { %s935_s10 = smov (%p35_p7, %s33_s10), 0  ;;  %p55_p10 = scmp.ne.s32.totalorder %s723_s16, %s719_s15 }
  0x15   : > { %s37_s13 = ssub.s32 %s735_s19, %s935_s10  ;;  %p149_p11 = scmp.eq.s32.totalorder %s448_s21, 1 }
  0x16   : > { %p40_p12 = scmp.eq.s32.totalorder %s37_s13, 0  ;;  %p840_p13 = por %p804_p1, %p55_p10 }
  0x17   : > { %p844_p0 = por %p149_p11, %p49_p8  ;;  %p155_p2 = scmp.eq.s32.totalorder %s449_s11, 1 }
  0x18   : > { %s849_s24 = scalar_select %p40_p12, %s727_s17, %s42_s12  }
  0x19   : > { %p51_p4 = por %p50_p9, %p49_p8  ;;  %p851_p5 = por %p155_p2, %p55_p10 }
  0x1a   : > { %s201_s27 = sand.u32 1, %s727_s17   ;;  %s455_s21 = sshll.u32 %s735_s19, 2 }
  0x1b   : > { %p505_p7 = scmp.lt.s32.totalorder %s739_s20, 2  ;;  %s454_s28 = sshll.u32 %s201_s27, 2 }
  0x1c   : > { %s210_s5 = scalar_lea.hbm %s919_s0, %s455_s21  ;;  %s205_s7 = scalar_lea.vmem [#allocation2], %s454_s28 }
  0x1d   : > { %s212_s6 = sshll.u32 %s210_s5, 4  ;;  %s214_s8 = sshll.u32 %s205_s7, 4  ;;  %s213_s6 = int_to_ptr.hbm [resolvable:$true] %s212_s6  ;;  %s215_s8 = int_to_ptr.vmem [resolvable:$true] %s214_s8 }
  0x1e   : > { %p496_p11 = pnand %p505_p7, %p51_p4  ;;  %s202_s9 = scalar_lea.sflag [#allocation3], %s201_s27 }
  0x1f   : > { %229 = sbr.rel (%p812_p3) target bundleno = 183 (0xb7), region = 36  ;;  %s864_s11 = sand.u32 (!%p812_p3), 1, %s723_s16  }
  0x20   : > { %498 = dma.hbm_to_vmem [thread:$0]  (!%p496_p11), %s213_s6, 64, %s215_s8, %s202_s9  }
  0x21   : > { %s457_s12 = sshll.u32 (!%p812_p3), %s864_s11, 2  ;;  %s232_s13 = scalar_lea.sflag (!%p812_p3), [#allocation3], %s864_s11 }
  0x22   : > { %s235_s21 = scalar_lea.vmem (!%p812_p3), [#allocation2], %s457_s12 }
  0x24   : > { %706 = dma.done.wait (%p840_p13), %s232_s13, 64  }
  0x25   : > { %708 = vsyncadd (%p840_p13), %s232_s13, 4294967232 }
  0x26   : > { %710 = dma.done.wait (%p804_p1), [#allocation6], 272  }
  0x27   : > { %712 = vsyncadd (%p804_p1), [#allocation6], 4294967024  ;;  %p274_p3 = scmp.lt.s32.totalorder %s731_s18, 1  ;;  %v475_v0 = vld [vmem:[#allocation5 + $0x8] sm:$0xff]  ;;  %v474_v1 = vld [vmem:[#allocation5] sm:$0xff]  ;;  %vm299_vm0 = vcmask 261120  }
  0x28   : > { %309 = vmatpush.bf16.msra.mxu0 %v475_v0  ;;  %v278_v2 = vld [vmem:[%s235_s21] sm:$0xf]  ;;  %s471_s14 = sshll.u32 %s731_s18, 2  ;;  %v561_v3 = vld [vmem:[#allocation7] ss:$0 sm:$0xff]  ;;  %s273_s6 = scalar_lea.vmem [#allocation8], %s457_s12 }
  0x29   : > { %s275_s26 = scalar_select %p274_p3, %s731_s18, 1 }
  0x2a   : > { %s335_s5 = scalar_lea.hbm %s923_s4, %s471_s14  ;;  %s337_s7 = sshll.u32 %s273_s6, 4  ;;  %s338_s7 = int_to_ptr.vmem [resolvable:$true] %s337_s7 }
  0x2b   : > { %s276_s29 = scalar_lea.vmem %s922_s3, %s275_s26  ;;  %s339_s8 = sshll.u32 %s335_s5, 4  ;;  %s340_s8 = int_to_ptr.hbm [resolvable:$true] %s339_s8 }
  0x2c   : > { %310 = vmatpush.bf16.msra.mxu0 %v474_v1  ;;  %v562_v4 = vld [vmem:[%s276_s29] ss:$0 sm:$0xff]  ;;  %s324_s9 = scalar_lea.sflag [#allocation4], %s864_s11  ;;  %s667_s18 = sshra.s32 %s340_s8, 4  ;;  %s668_s18 = int_to_ptr.hbm [resolvable:$true] %s667_s18 }
  0x2d   : > { %s669_s13 = scalar_lea.hbm %s668_s18, 4  ;;  %s673_s12 = scalar_lea.hbm %s923_s4, 8 }
  0x2e   : > { %p670_p1 = scmp.ne.s32.totalorder %s668_s18, %s669_s13  ;;  %p674_p10 = scmp.lt.s32.totalorder %s668_s18, %s923_s4 }
  0x2f   : > { %469 = vmatmul.msk.bf16.vlgmr.msra.gmra.mxu0 %vm299_vm0, %v278_v2  ;;  %p675_p12 = scmp.lt.s32.totalorder %s673_s12, %s669_s13 }
  0x30   : > { %p671_p8 = pnand %p670_p1, %p844_p0 }
  0x31   : > { %p676_p13 = por %p675_p12, %p674_p10 }
  0x32   : > { %p672_p9 = pneg %p671_p8 }
  0x34   : > { %p677_p2 = pnand %p676_p13, %p672_p9 }
  0xac   : > { %v312_v5 = vpop.f32.mrf.mxu0 }
  0xad   : > { %v313_v6 = vadd.f32 %v561_v3, %v312_v5 }
  0xaf   : > { %v320_v7 = vmul.f32 %v562_v4, %v313_v6 }
  0xb1   : > { %v321_v8 = vpack.c.bf16 %v320_v7, %v320_v7 }
  0xb3   : > { %322 = vst [vmem:[%s273_s6] sm:$0xf] %v321_v8 }
  0xb4   : > { %v314_v9 = vpop.f32.mrf.mxu0 }
  0xb5   : > { %680 = shalt.err (!%p677_p2)
}
  0xb6   : > { %486 = dma.vmem_to_hbm [thread:$0]  (%p844_p0), %s338_s7, 64, %s340_s8, %s324_s9  }
  0xb7 PF: > { %s351_s11 = sand.u32 1, %s719_s15   ;;  %p500_p4 = pnand %p453_p6, %p851_p5 }
  0xb8   : > { %s352_s29 = scalar_lea.sflag [#allocation4], %s351_s11 }
  0xb9   : > { %p501_p7 = pneg %p500_p4 }
  0xbb   : > { %714 = dma.done.wait (%p501_p7), %s352_s29, 64  }
  0xbc   : > { %716 = vsyncadd (%p501_p7), %s352_s29, 4294967232  ;;  %s21_s20 = sadd.s32 1, %s739_s20   ;;  %s929_s15 = smov %s723_s16 }
  0xbd   : > { %p18_p11 = scmp.ge.s32.totalorder %s21_s20, 4   ;;  %s930_s16 = smov %s727_s17 }
  0xbe   : > { %s931_s17 = smov %s849_s24  ;;  %s932_s18 = smov %s735_s19 }
  0xbf   : > { %s933_s19 = smov %s935_s10  ;;  %20 = sbr.rel (!%p18_p11) target bundleno = 7 (0x7), region = 92 }
  0xc4   :  { %358 = vsyncpa [#allocation3], 1 }
  0xc5   :  { %360 = vsyncpa [#allocation3 + $0x1], 1 }
  0xc6   :  { %361 = vsyncpa [#allocation6], 1 }
  0xc7   :  { %362 = vsyncpa [#allocation4], 1 }
  0xc8   :  { %364 = vsyncpa [#allocation4 + $0x1], 1 }

</bundles_post_ra>
